<compile_context>
chip_gen: v6e
topology: v6e:2x2x1
jax: 0.10.0
libtpu: 0.0.40
codegen_flags: <defaults>
</compile_context>

<pallas_src>
import jax
import jax.numpy as jnp
from jax.experimental import pallas as pl
from jax.experimental.pallas import tpu as pltpu


_EPS_SQ = 1e-24  # == (1e-12)^2 : matches torch F.normalize(p=2) eps clamp


# ----------------------------------------------------------------------------
# Fused Pallas kernel: grid step 0 -> text head, grid step 1 -> vision head
# ----------------------------------------------------------------------------
def _fused_kernel(xt_ref, wt_ref, bt_ref, m_ref,
                  xv_ref, wp_ref, bp_ref, wv_ref, bv_ref,
                  o_ref):
    step = pl.program_id(0)

    @pl.when(step == 0)
    def _():
        # text head: l2norm(tanh(xt @ wt + bt) * mask)
        h = jnp.dot(xt_ref[...], wt_ref[...], preferred_element_type=jnp.float32)
        h = jnp.tanh(h + bt_ref[...]) * m_ref[...]
        sq = jnp.sum(h * h, axis=1, keepdims=True)
        o_ref[0] = h * jax.lax.rsqrt(jnp.maximum(sq, _EPS_SQ))

    @pl.when(step == 1)
    def _():
        # vision head: l2norm(tanh(xv @ wp + bp) @ wv + bv)
        # The [Mp, 128] intermediate stays resident (never leaves VMEM/vregs).
        vis = jnp.dot(xv_ref[...], wp_ref[...], preferred_element_type=jnp.float32)
        vis = jnp.tanh(vis + bp_ref[...])
        img = jnp.dot(vis, wv_ref[...], preferred_element_type=jnp.float32) + bv_ref[...]
        sq = jnp.sum(img * img, axis=1, keepdims=True)
        o_ref[0] = img * jax.lax.rsqrt(jnp.maximum(sq, _EPS_SQ))


# ----------------------------------------------------------------------------
# One-time parameter packing (padding / casting hoisted out of the hot path)
# ----------------------------------------------------------------------------
def _round_up(x, m):
    return ((x + m - 1) // m) * m


def _pad_to(a, rows, cols):
    a = jnp.asarray(a, jnp.float32)
    return jnp.pad(a, ((0, rows - a.shape[0]), (0, cols - a.shape[1])))


def pack_params(params):
    """Zero-pad all weights/biases to 128-lane-dense f32 slabs, once."""
    dt = params["w_text"].shape[0]           # text_encoder_dim
    dv = params["w_patch"].shape[0]           # vision_encoder_dim
    kt = _round_up(dt, 128)                   # text contraction dim
    kv = _round_up(dv, 128)                   # vision patch contraction dim
    dvp = _round_up(dv, 128)                  # padded vision hidden dim
    np_ = _round_up(dt, 128)                  # padded output dim
    return {
        "embed":   jnp.asarray(params["embed"], jnp.float32),
        "w_text":  _pad_to(params["w_text"], kt, np_),
        "b_text":  _pad_to(params["b_text"].reshape(1, -1), 1, np_),
        "w_patch": _pad_to(params["w_patch"], kv, dvp),
        "b_patch": _pad_to(params["b_patch"].reshape(1, -1), 1, dvp),
        "w_vis":   _pad_to(params["w_vis"], dvp, np_),
        "b_vis":   _pad_to(params["b_vis"].reshape(1, -1), 1, np_),
    }


# ----------------------------------------------------------------------------
# Fused launch wrapper
# ----------------------------------------------------------------------------
def _fused_heads(xt, mask_g, xv, pp):
    """Single pallas_call computing both normalized heads; returns [2, Mp, Np]."""
    B = xt.shape[0]
    Mp = _round_up(max(B, 8), 8)               # sublane-dense rows (f32)
    Kt = pp["w_text"].shape[0]                 # 128
    Np = pp["w_text"].shape[1]                 # 128
    Kv = pp["w_patch"].shape[0]                # 128
    Dvp = pp["w_patch"].shape[1]               # 128

    # Per-call activation padding only (weights are pre-packed).
    xt_p = jnp.zeros((Mp, Kt), jnp.float32).at[:B, :xt.shape[1]].set(
        xt.astype(jnp.float32))
    xv_p = jnp.zeros((Mp, Kv), jnp.float32).at[:B, :xv.shape[1]].set(
        xv.astype(jnp.float32))
    m_p = jnp.zeros((Mp, 1), jnp.float32).at[:B, :].set(
        mask_g.reshape(B, 1).astype(jnp.float32))

    out = pl.pallas_call(
        _fused_kernel,
        out_shape=jax.ShapeDtypeStruct((2, Mp, Np), jnp.float32),
        grid=(2,),
        in_specs=[
            pl.BlockSpec((Mp, Kt), lambda i: (0, 0)),    # xt
            pl.BlockSpec((Kt, Np), lambda i: (0, 0)),    # w_text
            pl.BlockSpec((1, Np), lambda i: (0, 0)),     # b_text
            pl.BlockSpec((Mp, 1), lambda i: (0, 0)),     # mask
            pl.BlockSpec((Mp, Kv), lambda i: (0, 0)),    # xv
            pl.BlockSpec((Kv, Dvp), lambda i: (0, 0)),   # w_patch
            pl.BlockSpec((1, Dvp), lambda i: (0, 0)),    # b_patch
            pl.BlockSpec((Dvp, Np), lambda i: (0, 0)),   # w_vis
            pl.BlockSpec((1, Np), lambda i: (0, 0)),     # b_vis
        ],
        out_specs=pl.BlockSpec((1, Mp, Np), lambda i: (i, 0, 0)),
        compiler_params=pltpu.CompilerParams(dimension_semantics=("parallel",)),
    )(xt_p, pp["w_text"], pp["b_text"], m_p,
      xv_p, pp["w_patch"], pp["b_patch"], pp["w_vis"], pp["b_vis"])
    return out


# ----------------------------------------------------------------------------
# CLIP_model forward (JAX glue around the single Pallas launch)
# ----------------------------------------------------------------------------
def clip_forward(packed, input_ids, attention_mask, images,
                 target_value=1, patch=4):
    dt = packed["embed"].shape[1]              # text_encoder_dim (output width)
    B = input_ids.shape[0]

    # ---- torch.nonzero(input_ids == target_value) per-row token index -------
    # TODO(synk): torch.nonzero returns all matches; we assume exactly one
    # target token per row (first match via argmax; position 0 if none).
    idx = jnp.argmax(input_ids == target_value, axis=1)                  # [B]

    # ---- synthetic text_encoder (embedding + dense + tanh + mask), evaluated
    # only at the gathered target token (identical result, 1/L the work).
    tok = jnp.take_along_axis(input_ids, idx[:, None], axis=1)[:, 0]     # [B]
    emb = packed["embed"][tok]                                           # [B, Dt]
    mask_g = jnp.take_along_axis(attention_mask, idx[:, None], axis=1)   # [B, 1]

    # ---- synthetic vision_encoder (patchify + dense + tanh) + vision_linear.
    # Only patch 0 of each image reaches image_output[:, 0, :], so only that
    # patch (top-left PxP block, flattened [C, P, P] row-major) is projected.
    P = patch
    patch0 = images[:, :, :P, :P].reshape(images.shape[0], -1)           # [B, C*P*P]

    out = _fused_heads(emb, mask_g, patch0, packed)                      # [2,Mp,Np]
    texts_output = out[0, :B, :dt]
    image_output = out[1, :B, :dt]
    return texts_output, image_output


# ----------------------------------------------------------------------------
if __name__ == "__main__":
    key = jax.random.PRNGKey(0)
    B, L = 2, 8                       # batch, text sequence length
    VOCAB, DT = 64, 32                # vocab size, text_encoder_dim
    C, H, W, P = 3, 16, 16, 4         # image NCHW, patch size
    DV = C * P * P                    # vision_encoder_dim = 48

    keys = jax.random.split(key, 8)
    params = {
        "embed":   jax.random.normal(keys[0], (VOCAB, DT), jnp.float32) * 0.1,
        "w_text":  jax.random.normal(keys[1], (DT, DT), jnp.float32) * 0.1,
        "b_text":  jax.random.normal(keys[2], (DT,), jnp.float32) * 0.1,
        "w_patch": jax.random.normal(keys[3], (DV, DV), jnp.float32) * 0.1,
        "b_patch": jax.random.normal(keys[4], (DV,), jnp.float32) * 0.1,
        "w_vis":   jax.random.normal(keys[5], (DV, DT), jnp.float32) * 0.1,
        "b_vis":   jax.random.normal(keys[6], (DT,), jnp.float32) * 0.1,
    }
    packed = jax.tree_util.tree_map(jnp.asarray, pack_params(params))  # pack once

    # deterministic inputs; exactly one target token (=1) per text row
    input_ids = jax.random.randint(keys[7], (B, L), 2, VOCAB, dtype=jnp.int32)
    target_pos = jnp.array([3, 5], dtype=jnp.int32)
    input_ids = input_ids.at[jnp.arange(B), target_pos].set(1)
    attention_mask = jnp.ones((B, L), jnp.int32)
    images = jax.random.normal(jax.random.PRNGKey(42), (B, C, H, W), jnp.float32)

    fwd = jax.jit(clip_forward, static_argnames=("target_value", "patch"))
    texts_out, image_out = fwd(packed, input_ids, attention_mask, images)
    jax.block_until_ready((texts_out, image_out))

    # pure-JAX reference of the same forward (synthetic encoders, f32)
    idx = jnp.argmax(input_ids == 1, axis=1)
    tok = jnp.take_along_axis(input_ids, idx[:, None], axis=1)[:, 0]
    mref = jnp.take_along_axis(attention_mask, idx[:, None], axis=1).astype(jnp.float32)
    h = jnp.tanh(params["embed"][tok] @ params["w_text"] + params["b_text"]) * mref
    t_ref = h / jnp.maximum(jnp.linalg.norm(h, axis=1, keepdims=True), 1e-12)
    p0 = images[:, :, :P, :P].reshape(B, -1)
    vis = jnp.tanh(p0 @ params["w_patch"] + params["b_patch"])
    img = vis @ params["w_vis"] + params["b_vis"]
    i_ref = img / jnp.maximum(jnp.linalg.norm(img, axis=1, keepdims=True), 1e-12)

    assert texts_out.shape == (B, DT) and image_out.shape == (B, DT)
    assert texts_out.dtype == jnp.float32 and image_out.dtype == jnp.float32
    assert bool(jnp.allclose(jnp.linalg.norm(texts_out, axis=1), 1.0, atol=1e-5))
    assert bool(jnp.allclose(jnp.linalg.norm(image_out, axis=1), 1.0, atol=1e-5))
    assert bool(jnp.allclose(texts_out, t_ref, atol=1e-5, rtol=1e-5))
    assert bool(jnp.allclose(image_out, i_ref, atol=1e-5, rtol=1e-5))
    print("KERNEL_OK")
</pallas_src>

<mosaic_0001>
module attributes {stable_mosaic.version = 11 : i64} {
  func.func @_fused_kernel(%arg0: i32, %arg1: memref<8x128xf32, #tpu.memory_space<vmem>>, %arg2: memref<128x128xf32, #tpu.memory_space<vmem>>, %arg3: memref<1x128xf32, #tpu.memory_space<vmem>>, %arg4: memref<8x1xf32, #tpu.memory_space<vmem>>, %arg5: memref<8x128xf32, #tpu.memory_space<vmem>>, %arg6: memref<128x128xf32, #tpu.memory_space<vmem>>, %arg7: memref<1x128xf32, #tpu.memory_space<vmem>>, %arg8: memref<128x128xf32, #tpu.memory_space<vmem>>, %arg9: memref<1x128xf32, #tpu.memory_space<vmem>>, %arg10: memref<1x8x128xf32, #tpu.memory_space<vmem>>) attributes {dimension_semantics = [#tpu.dimension_semantics<parallel>], iteration_bounds = array<i64: 2>, scalar_prefetch = 0 : i64, scratch_operands = 0 : i64, tpu.core_type = #tpu.core_type<tc>, window_params = [{pipeline_mode = #tpu.pipeline_mode<synchronous>, transform_indices = @transform_0, window_bounds = array<i64: 8, 128>}, {pipeline_mode = #tpu.pipeline_mode<synchronous>, transform_indices = @transform_1, window_bounds = array<i64: 128, 128>}, {pipeline_mode = #tpu.pipeline_mode<synchronous>, transform_indices = @transform_2, window_bounds = array<i64: 1, 128>}, {pipeline_mode = #tpu.pipeline_mode<synchronous>, transform_indices = @transform_3, window_bounds = array<i64: 8, 1>}, {pipeline_mode = #tpu.pipeline_mode<synchronous>, transform_indices = @transform_4, window_bounds = array<i64: 8, 128>}, {pipeline_mode = #tpu.pipeline_mode<synchronous>, transform_indices = @transform_5, window_bounds = array<i64: 128, 128>}, {pipeline_mode = #tpu.pipeline_mode<synchronous>, transform_indices = @transform_6, window_bounds = array<i64: 1, 128>}, {pipeline_mode = #tpu.pipeline_mode<synchronous>, transform_indices = @transform_7, window_bounds = array<i64: 128, 128>}, {pipeline_mode = #tpu.pipeline_mode<synchronous>, transform_indices = @transform_8, window_bounds = array<i64: 1, 128>}, {transform_indices = @transform_9, window_bounds = array<i64: 1, 8, 128>}]} {
    %c0_i32 = arith.constant 0 : i32
    %0 = arith.cmpi eq, %arg0, %c0_i32 : i32
    %1 = arith.extui %0 : i1 to i32
    %c0_i32_0 = arith.constant 0 : i32
    %2 = arith.cmpi ne, %1, %c0_i32_0 : i32
    scf.if %2 {
      %c0 = arith.constant 0 : index
      %c0_2 = arith.constant 0 : index
      %6 = vector.load %arg1[%c0, %c0_2] : memref<8x128xf32, #tpu.memory_space<vmem>>, vector<8x128xf32>
      %c0_3 = arith.constant 0 : index
      %c0_4 = arith.constant 0 : index
      %7 = vector.load %arg2[%c0_3, %c0_4] : memref<128x128xf32, #tpu.memory_space<vmem>>, vector<128x128xf32>
      %cst = arith.constant dense<0.000000e+00> : vector<8x128xf32>
      %8 = tpu.matmul %6, %7, %cst {dimension_numbers = #tpu.dot_dimension_numbers<[1], [0], [0], [1], [0, 0, 1, 1], [], []>} : vector<8x128xf32>, vector<128x128xf32>, vector<8x128xf32> -> vector<8x128xf32>
      %c0_5 = arith.constant 0 : index
      %c0_6 = arith.constant 0 : index
      %9 = vector.load %arg3[%c0_5, %c0_6] : memref<1x128xf32, #tpu.memory_space<vmem>>, vector<1x128xf32>
      %10 = vector.broadcast %9 : vector<1x128xf32> to vector<8x128xf32>
      %11 = arith.addf %8, %10 : vector<8x128xf32>
      %12 = math.tanh %11 : vector<8x128xf32>
      %c0_7 = arith.constant 0 : index
      %c0_8 = arith.constant 0 : index
      %13 = vector.load %arg4[%c0_7, %c0_8] : memref<8x1xf32, #tpu.memory_space<vmem>>, vector<8x1xf32>
      %14 = vector.broadcast %13 : vector<8x1xf32> to vector<8x128xf32>
      %15 = arith.mulf %12, %14 : vector<8x128xf32>
      %16 = arith.mulf %15, %15 : vector<8x128xf32>
      %cst_9 = arith.constant dense<0.000000e+00> : vector<8xf32>
      %17 = vector.multi_reduction <add>, %16, %cst_9 [1] : vector<8x128xf32> to vector<8xf32>
      %18 = vector.shape_cast %17 : vector<8xf32> to vector<8x1xf32>
      %cst_10 = arith.constant 1.000000e-24 : f32
      %19 = vector.broadcast %cst_10 : f32 to vector<8x1xf32>
      %20 = arith.maximumf %18, %19 : vector<8x1xf32>
      %21 = math.rsqrt %20 : vector<8x1xf32>
      %22 = vector.broadcast %21 : vector<8x1xf32> to vector<8x128xf32>
      %23 = arith.mulf %15, %22 : vector<8x128xf32>
      %c0_11 = arith.constant 0 : index
      %c0_12 = arith.constant 0 : index
      %c0_13 = arith.constant 0 : index
      %24 = vector.load %arg10[%c0_11, %c0_12, %c0_13] : memref<1x8x128xf32, #tpu.memory_space<vmem>>, vector<1x8x128xf32>
      %25 = vector.shape_cast %24 : vector<1x8x128xf32> to vector<8x128xf32>
      %26 = vector.shape_cast %23 : vector<8x128xf32> to vector<1x8x128xf32>
      tpu.vector_store %arg10[%c0_11, %c0_12, %c0_13], %26 {strides = array<i32>} : memref<1x8x128xf32, #tpu.memory_space<vmem>>, vector<1x8x128xf32>,
    } else {
    }
    %c1_i32 = arith.constant 1 : i32
    %3 = arith.cmpi eq, %arg0, %c1_i32 : i32
    %4 = arith.extui %3 : i1 to i32
    %c0_i32_1 = arith.constant 0 : i32
    %5 = arith.cmpi ne, %4, %c0_i32_1 : i32
    scf.if %5 {
      %c0 = arith.constant 0 : index
      %c0_2 = arith.constant 0 : index
      %6 = vector.load %arg5[%c0, %c0_2] : memref<8x128xf32, #tpu.memory_space<vmem>>, vector<8x128xf32>
      %c0_3 = arith.constant 0 : index
      %c0_4 = arith.constant 0 : index
      %7 = vector.load %arg6[%c0_3, %c0_4] : memref<128x128xf32, #tpu.memory_space<vmem>>, vector<128x128xf32>
      %cst = arith.constant dense<0.000000e+00> : vector<8x128xf32>
      %8 = tpu.matmul %6, %7, %cst {dimension_numbers = #tpu.dot_dimension_numbers<[1], [0], [0], [1], [0, 0, 1, 1], [], []>} : vector<8x128xf32>, vector<128x128xf32>, vector<8x128xf32> -> vector<8x128xf32>
      %c0_5 = arith.constant 0 : index
      %c0_6 = arith.constant 0 : index
      %9 = vector.load %arg7[%c0_5, %c0_6] : memref<1x128xf32, #tpu.memory_space<vmem>>, vector<1x128xf32>
      %10 = vector.broadcast %9 : vector<1x128xf32> to vector<8x128xf32>
      %11 = arith.addf %8, %10 : vector<8x128xf32>
      %12 = math.tanh %11 : vector<8x128xf32>
      %c0_7 = arith.constant 0 : index
      %c0_8 = arith.constant 0 : index
      %13 = vector.load %arg8[%c0_7, %c0_8] : memref<128x128xf32, #tpu.memory_space<vmem>>, vector<128x128xf32>
      %cst_9 = arith.constant dense<0.000000e+00> : vector<8x128xf32>
      %14 = tpu.matmul %12, %13, %cst_9 {dimension_numbers = #tpu.dot_dimension_numbers<[1], [0], [0], [1], [0, 0, 1, 1], [], []>} : vector<8x128xf32>, vector<128x128xf32>, vector<8x128xf32> -> vector<8x128xf32>
      %c0_10 = arith.constant 0 : index
      %c0_11 = arith.constant 0 : index
      %15 = vector.load %arg9[%c0_10, %c0_11] : memref<1x128xf32, #tpu.memory_space<vmem>>, vector<1x128xf32>
      %16 = vector.broadcast %15 : vector<1x128xf32> to vector<8x128xf32>
      %17 = arith.addf %14, %16 : vector<8x128xf32>
      %18 = arith.mulf %17, %17 : vector<8x128xf32>
      %cst_12 = arith.constant dense<0.000000e+00> : vector<8xf32>
      %19 = vector.multi_reduction <add>, %18, %cst_12 [1] : vector<8x128xf32> to vector<8xf32>
      %20 = vector.shape_cast %19 : vector<8xf32> to vector<8x1xf32>
      %cst_13 = arith.constant 1.000000e-24 : f32
      %21 = vector.broadcast %cst_13 : f32 to vector<8x1xf32>
      %22 = arith.maximumf %20, %21 : vector<8x1xf32>
      %23 = math.rsqrt %22 : vector<8x1xf32>
      %24 = vector.broadcast %23 : vector<8x1xf32> to vector<8x128xf32>
      %25 = arith.mulf %17, %24 : vector<8x128xf32>
      %c0_14 = arith.constant 0 : index
      %c0_15 = arith.constant 0 : index
      %c0_16 = arith.constant 0 : index
      %26 = vector.load %arg10[%c0_14, %c0_15, %c0_16] : memref<1x8x128xf32, #tpu.memory_space<vmem>>, vector<1x8x128xf32>
      %27 = vector.shape_cast %26 : vector<1x8x128xf32> to vector<8x128xf32>
      %28 = vector.shape_cast %25 : vector<8x128xf32> to vector<1x8x128xf32>
      tpu.vector_store %arg10[%c0_14, %c0_15, %c0_16], %28 {strides = array<i32>} : memref<1x8x128xf32, #tpu.memory_space<vmem>>, vector<1x8x128xf32>,
    } else {
    }
    return
  }
  func.func @transform_0(%arg0: i32) -> (i32, i32) {
    %c0_i32 = arith.constant 0 : i32
    %c0_i32_0 = arith.constant 0 : i32
    %c0_i32_1 = arith.constant 0 : i32
    return %c0_i32, %c0_i32_0 : i32, i32
  }
  func.func @transform_1(%arg0: i32) -> (i32, i32) {
    %c0_i32 = arith.constant 0 : i32
    %c0_i32_0 = arith.constant 0 : i32
    %c0_i32_1 = arith.constant 0 : i32
    return %c0_i32, %c0_i32_0 : i32, i32
  }
  func.func @transform_2(%arg0: i32) -> (i32, i32) {
    %c0_i32 = arith.constant 0 : i32
    %c0_i32_0 = arith.constant 0 : i32
    %c0_i32_1 = arith.constant 0 : i32
    return %c0_i32, %c0_i32_0 : i32, i32
  }
  func.func @transform_3(%arg0: i32) -> (i32, i32) {
    %c0_i32 = arith.constant 0 : i32
    %c0_i32_0 = arith.constant 0 : i32
    %c0_i32_1 = arith.constant 0 : i32
    return %c0_i32, %c0_i32_0 : i32, i32
  }
  func.func @transform_4(%arg0: i32) -> (i32, i32) {
    %c0_i32 = arith.constant 0 : i32
    %c0_i32_0 = arith.constant 0 : i32
    %c0_i32_1 = arith.constant 0 : i32
    return %c0_i32, %c0_i32_0 : i32, i32
  }
  func.func @transform_5(%arg0: i32) -> (i32, i32) {
    %c0_i32 = arith.constant 0 : i32
    %c0_i32_0 = arith.constant 0 : i32
    %c0_i32_1 = arith.constant 0 : i32
    return %c0_i32, %c0_i32_0 : i32, i32
  }
  func.func @transform_6(%arg0: i32) -> (i32, i32) {
    %c0_i32 = arith.constant 0 : i32
    %c0_i32_0 = arith.constant 0 : i32
    %c0_i32_1 = arith.constant 0 : i32
    return %c0_i32, %c0_i32_0 : i32, i32
  }
  func.func @transform_7(%arg0: i32) -> (i32, i32) {
    %c0_i32 = arith.constant 0 : i32
    %c0_i32_0 = arith.constant 0 : i32
    %c0_i32_1 = arith.constant 0 : i32
    return %c0_i32, %c0_i32_0 : i32, i32
  }
  func.func @transform_8(%arg0: i32) -> (i32, i32) {
    %c0_i32 = arith.constant 0 : i32
    %c0_i32_0 = arith.constant 0 : i32
    %c0_i32_1 = arith.constant 0 : i32
    return %c0_i32, %c0_i32_0 : i32, i32
  }
  func.func @transform_9(%arg0: i32) -> (i32, i32, i32) {
    %c0_i32 = arith.constant 0 : i32
    %c0_i32_0 = arith.constant 0 : i32
    %c0_i32_1 = arith.constant 0 : i32
    return %arg0, %c0_i32, %c0_i32_0 : i32, i32, i32
  }
}

</mosaic_0001>

<bundles_post_ra>
// kernel: clip_forward.1
= control target key start
LH: loop header
LB: loop body
LE: loop exit
PB: predicated region body
PF: predicated region fallthrough
CT: control target
= control target key end

     0   :  { %s917_s30 = smov 0   ;;  %s1137_s0 = inlined_call_operand.vmem [shape: f32[8,128], index: 0, kind: input, shape index: {}]   ;;  %s1138_s1 = inlined_call_operand.vmem [shape: f32[128,128], index: 1, kind: input, shape index: {}]   ;;  %s1139_s2 = inlined_call_operand.vmem [shape: f32[1,128], index: 2, kind: input, shape index: {}]   ;;  %s1140_s3 = inlined_call_operand.vmem [shape: f32[8,1], index: 3, kind: input, shape index: {}]   ;;  %s1141_s4 = inlined_call_operand.vmem [shape: f32[8,128], index: 4, kind: input, shape index: {}]   ;;  %s1142_s5 = inlined_call_operand.vmem [shape: f32[128,128], index: 5, kind: input, shape index: {}]   ;;  %s1143_s6 = inlined_call_operand.vmem [shape: f32[1,128], index: 6, kind: input, shape index: {}]   ;;  %s1144_s7 = inlined_call_operand.vmem [shape: f32[128,128], index: 7, kind: input, shape index: {}]   ;;  %s1145_s8 = inlined_call_operand.vmem [shape: f32[1,128], index: 8, kind: input, shape index: {}]   ;;  %s1146_s9 = inlined_call_operand.vmem [shape: f32[2,8,128], index: 9, kind: output, shape index: {}]  }
   0x1 LB: > { %s923_s10 = sadd.s32 4294967295, %s860_s30   ;;  %p667_p0 = scmp.ge.s32.totalorder %s860_s30, 1  ;;  %s860_s30 = sphi %s917_s30, %s19_s30  }
   0x2   : > { %p277_p1 = scmp.lt.s32.totalorder %s860_s30, 3 }
   0x4   : > { %p278_p2 = pnand %p667_p0, %p277_p1 }
   0x5   : > { %p307_p3 = scmp.lt.s32.totalorder (!%p278_p2), %s923_s10, 1  ;;  %p669_p4 = scmp.ne.s32.totalorder (!%p278_p2), %s923_s10, 0 }
   0x6   : > { %281 = sbr.rel (%p278_p2) target bundleno = 1023 (0x3ff), region = 56 }
   0xb   : > { %s308_s11 = scalar_select %p307_p3, %s923_s10, 1 }
   0xc   : > { %314 = sbr.rel (%p669_p4) target bundleno = 420 (0x1a4), region = 60 }
   0xd   : > { %s668_s12 = sshll.u32 %s308_s11, 3 }
   0xe   : > { %s932_s15 = scalar_lea.vmem %s1146_s9, %s668_s12 }
  0x11   : > { %v331_v0 = vld [vmem:[%s1138_s1 + $0x78] sm:$0xff]  ;;  %v862_v1 = vmov 0.0   ;;  %v330_v2 = vld [vmem:[%s1138_s1 + $0x70] sm:$0xff]  ;;  %vm863_vm0 = vmmov 0   ;;  %v864_v3 = vmov 0   ;;  %v329_v4 = vld [vmem:[%s1138_s1 + $0x68] sm:$0xff] }
  0x12   : > { %727 = vmatprep.subr.mxu0 %v862_v1  ;;  %759 = vmatprep.mubr.msk.f32.mxu0 %vm863_vm0, %v862_v1  ;;  %v328_v5 = vld [vmem:[%s1138_s1 + $0x60] sm:$0xff]  ;;  %v327_v7 = vld [vmem:[%s1138_s1 + $0x58] sm:$0xff]  ;;  %v326_v8 = vld [vmem:[%s1138_s1 + $0x50] sm:$0xff] }
  0x13   : > { %728 = vmatpush3.msra.mxu0 %v331_v0  ;;  %845 = vset.pattern.permute.xlu0 %v864_v3  ;;  %v410_v6 = vld [vmem:[%s1140_s3] sm:$0xff]  ;;  %v325_v9 = vld [vmem:[%s1138_s1 + $0x48] sm:$0xff]  ;;  %v323_v11 = vld [vmem:[%s1138_s1 + $0x38] sm:$0xff] }
  0x14   : > { %729 = vmatprep.subr.mxu0 %v862_v1  ;;  %413 = vperm.xlu0 %845, %v410_v6   ;;  %v324_v10 = vld [vmem:[%s1138_s1 + $0x40] sm:$0xff]  ;;  %v322_v12 = vld [vmem:[%s1138_s1 + $0x30] sm:$0xff]  ;;  %v321_v13 = vld [vmem:[%s1138_s1 + $0x28] sm:$0xff] }
  0x15   : > { %730 = vmatpush3.msra.mxu0 %v330_v2  ;;  %v320_v14 = vld [vmem:[%s1138_s1 + $0x20] sm:$0xff]  ;;  %v319_v15 = vld [vmem:[%s1138_s1 + $0x18] sm:$0xff]  ;;  %v318_v16 = vld [vmem:[%s1138_s1 + $0x10] sm:$0xff] }
  0x16   : > { %731 = vmatprep.subr.mxu0 %v862_v1  ;;  %v317_v17 = vld [vmem:[%s1138_s1 + $0x8] sm:$0xff]  ;;  %v316_v18 = vld [vmem:[%s1138_s1] sm:$0xff] }
  0x17   : > { %732 = vmatpush3.msra.mxu0 %v329_v4  ;;  %v315_v19 = vld [vmem:[%s1137_s0] sm:$0xff] }
  0x18   : > { %733 = vmatprep.subr.mxu0 %v862_v1  ;;  %v670_v20 = vld [vmem:[%s1139_s2] ss:$0 sm:$0xff] }
  0x19   : > { %734 = vmatpush3.msra.mxu0 %v328_v5 }
  0x1a   : > { %735 = vmatprep.subr.mxu0 %v862_v1 }
  0x1b   : > { %736 = vmatpush3.msra.mxu0 %v327_v7 }
  0x1c   : > { %737 = vmatprep.subr.mxu0 %v862_v1 }
  0x1d   : > { %738 = vmatpush3.msra.mxu0 %v326_v8 }
  0x1e   : > { %739 = vmatprep.subr.mxu0 %v862_v1 }
  0x1f   : > { %740 = vmatpush3.msra.mxu0 %v325_v9 }
  0x20   : > { %741 = vmatprep.subr.mxu0 %v862_v1 }
  0x21   : > { %742 = vmatpush3.msra.mxu0 %v324_v10 }
  0x22   : > { %743 = vmatprep.subr.mxu0 %v862_v1 }
  0x23   : > { %744 = vmatpush3.msra.mxu0 %v323_v11 }
  0x24   : > { %745 = vmatprep.subr.mxu0 %v862_v1 }
  0x25   : > { %746 = vmatpush3.msra.mxu0 %v322_v12 }
  0x26   : > { %747 = vmatprep.subr.mxu0 %v862_v1 }
  0x27   : > { %748 = vmatpush3.msra.mxu0 %v321_v13 }
  0x28   : > { %749 = vmatprep.subr.mxu0 %v862_v1 }
  0x29   : > { %750 = vmatpush3.msra.mxu0 %v320_v14 }
  0x2a   : > { %751 = vmatprep.subr.mxu0 %v862_v1 }
  0x2b   : > { %752 = vmatpush3.msra.mxu0 %v319_v15 }
  0x2c   : > { %753 = vmatprep.subr.mxu0 %v862_v1 }
  0x2d   : > { %754 = vmatpush3.msra.mxu0 %v318_v16 }
  0x2e   : > { %755 = vmatprep.subr.mxu0 %v862_v1 }
  0x2f   : > { %756 = vmatpush3.msra.mxu0 %v317_v17 }
  0x30   : > { %757 = vmatprep.subr.mxu0 %v862_v1 }
  0x31   : > { %758 = vmatpush3.msra.mxu0 %v316_v18 }
  0x32   : > { %760 = vmatmul.mubr.f32.vlgmr.msra.gmra.mxu0 %v315_v19 }
  0x8f   : > { %v414_v24 = vpop.permute.xlu0 %413 }
  0xf2   : > { %v405_v21 = vpop.f32.mrf.mxu0 }
  0xf3   : > { %v406_v22 = vadd.f32 %v670_v20, %v405_v21 }
  0xf4   : > { %v761_v23 = vpop.f32.mrf.mxu0 }
  0xf5   : > { %846 = vtanh.f32 %v406_v22 }
 0x102   : > { %v847_v25 = vpop.eup %846 }
 0x103   : > { %v416_v26 = vmul.f32 %v847_v25, %v414_v24 }
 0x105   : > { %v417_v27 = vmul.f32 %v416_v26, %v416_v26 }
 0x107   : > { %418 = vadd.xlane.f32.xlu0 %v417_v27 }
 0x190   : > { %v419_v28 = vpop.xlane.xlu0 %418 }
 0x191   : > { %v420_v29 = vmax.f32 %v419_v28, 1e-24 }
 0x193   : > { %848 = vrsqrt.f32 %v420_v29 }
 0x1a0   : > { %v849_v30 = vpop.eup %848 }
 0x1a1   : > { %v422_v31 = vmul.f32 %v849_v30, %v416_v26 }
 0x1a3   : > { %423 = vst [vmem:[%s932_s15] sm:$0xff] %v422_v31 }
 0x1a4 PF: > { %p671_p5 = scmp.ne.s32.totalorder %s923_s10, 1 }
 0x1a6   : > { %427 = sbr.rel (%p671_p5) target bundleno = 1023 (0x3ff), region = 64 }
 0x1ab   : > { %v444_v32 = vld [vmem:[%s1142_s5 + $0x78] sm:$0xff]  ;;  %v865_v33 = vmov 0.0   ;;  %v443_v34 = vld [vmem:[%s1142_s5 + $0x70] sm:$0xff]  ;;  %vm866_vm1 = vmmov 0   ;;  %v442_v35 = vld [vmem:[%s1142_s5 + $0x68] sm:$0xff] }
 0x1ac   : > { %762 = vmatprep.subr.mxu0 %v865_v33  ;;  %794 = vmatprep.mubr.msk.f32.mxu0 %vm866_vm1, %v865_v33  ;;  %v441_v36 = vld [vmem:[%s1142_s5 + $0x60] sm:$0xff]  ;;  %v538_v37 = vld [vmem:[%s1144_s7 + $0x78] sm:$0xff]  ;;  %v537_v38 = vld [vmem:[%s1144_s7 + $0x70] sm:$0xff] }
 0x1ad   : > { %763 = vmatpush3.msra.mxu0 %v444_v32  ;;  %797 = vmatprep.subr.mxu1 %v865_v33  ;;  %v440_v39 = vld [vmem:[%s1142_s5 + $0x58] sm:$0xff]  ;;  %v536_v40 = vld [vmem:[%s1144_s7 + $0x68] sm:$0xff]  ;;  %v439_v41 = vld [vmem:[%s1142_s5 + $0x50] sm:$0xff] }
 0x1ae   : > { %764 = vmatprep.subr.mxu0 %v865_v33  ;;  %829 = vmatprep.mubr.msk.f32.mxu1 %vm866_vm1, %v865_v33  ;;  %v535_v42 = vld [vmem:[%s1144_s7 + $0x60] sm:$0xff]  ;;  %v438_v43 = vld [vmem:[%s1142_s5 + $0x48] sm:$0xff]  ;;  %v534_v44 = vld [vmem:[%s1144_s7 + $0x58] sm:$0xff] }
 0x1af   : > { %765 = vmatpush3.msra.mxu0 %v443_v34  ;;  %798 = vmatpush3.msra.mxu1 %v538_v37  ;;  %v437_v45 = vld [vmem:[%s1142_s5 + $0x40] sm:$0xff]  ;;  %v533_v46 = vld [vmem:[%s1144_s7 + $0x50] sm:$0xff]  ;;  %v436_v47 = vld [vmem:[%s1142_s5 + $0x38] sm:$0xff] }
 0x1b0   : > { %766 = vmatprep.subr.mxu0 %v865_v33  ;;  %799 = vmatprep.subr.mxu1 %v865_v33  ;;  %v532_v48 = vld [vmem:[%s1144_s7 + $0x48] sm:$0xff]  ;;  %v435_v49 = vld [vmem:[%s1142_s5 + $0x30] sm:$0xff]  ;;  %v433_v51 = vld [vmem:[%s1142_s5 + $0x20] sm:$0xff] }
 0x1b1   : > { %767 = vmatpush3.msra.mxu0 %v442_v35  ;;  %800 = vmatpush3.msra.mxu1 %v537_v38  ;;  %v434_v50 = vld [vmem:[%s1142_s5 + $0x28] sm:$0xff]  ;;  %v432_v52 = vld [vmem:[%s1142_s5 + $0x18] sm:$0xff]  ;;  %v431_v53 = vld [vmem:[%s1142_s5 + $0x10] sm:$0xff] }
 0x1b2   : > { %768 = vmatprep.subr.mxu0 %v865_v33  ;;  %801 = vmatprep.subr.mxu1 %v865_v33  ;;  %v430_v54 = vld [vmem:[%s1142_s5 + $0x8] sm:$0xff]  ;;  %v429_v55 = vld [vmem:[%s1142_s5] sm:$0xff]  ;;  %v530_v58 = vld [vmem:[%s1144_s7 + $0x38] sm:$0xff] }
 0x1b3   : > { %769 = vmatpush3.msra.mxu0 %v441_v36  ;;  %802 = vmatpush3.msra.mxu1 %v536_v40  ;;  %v428_v56 = vld [vmem:[%s1141_s4] sm:$0xff]  ;;  %v529_v59 = vld [vmem:[%s1144_s7 + $0x30] sm:$0xff]  ;;  %v528_v60 = vld [vmem:[%s1144_s7 + $0x28] sm:$0xff] }
 0x1b4   : > { %770 = vmatprep.subr.mxu0 %v865_v33  ;;  %803 = vmatprep.subr.mxu1 %v865_v33  ;;  %v531_v57 = vld [vmem:[%s1144_s7 + $0x40] sm:$0xff]  ;;  %v526_v62 = vld [vmem:[%s1144_s7 + $0x18] sm:$0xff]  ;;  %v525_v63 = vld [vmem:[%s1144_s7 + $0x10] sm:$0xff] }
 0x1b5   : > { %771 = vmatpush3.msra.mxu0 %v440_v39  ;;  %804 = vmatpush3.msra.mxu1 %v535_v42  ;;  %v527_v61 = vld [vmem:[%s1144_s7 + $0x20] sm:$0xff]  ;;  %v524_v0 = vld [vmem:[%s1144_s7 + $0x8] sm:$0xff] }
 0x1b6   : > { %772 = vmatprep.subr.mxu0 %v865_v33  ;;  %805 = vmatprep.subr.mxu1 %v865_v33  ;;  %v523_v1 = vld [vmem:[%s1144_s7] sm:$0xff] }
 0x1b7   : > { %773 = vmatpush3.msra.mxu0 %v439_v41  ;;  %806 = vmatpush3.msra.mxu1 %v534_v44  ;;  %v672_v2 = vld [vmem:[%s1143_s6] ss:$0 sm:$0xff] }
 0x1b8   : > { %774 = vmatprep.subr.mxu0 %v865_v33  ;;  %807 = vmatprep.subr.mxu1 %v865_v33  ;;  %v673_v7 = vld [vmem:[%s1145_s8] ss:$0 sm:$0xff] }
 0x1b9   : > { %775 = vmatpush3.msra.mxu0 %v438_v43  ;;  %808 = vmatpush3.msra.mxu1 %v533_v46 }
 0x1ba   : > { %776 = vmatprep.subr.mxu0 %v865_v33  ;;  %809 = vmatprep.subr.mxu1 %v865_v33 }
 0x1bb   : > { %777 = vmatpush3.msra.mxu0 %v437_v45  ;;  %810 = vmatpush3.msra.mxu1 %v532_v48 }
 0x1bc   : > { %778 = vmatprep.subr.mxu0 %v865_v33  ;;  %811 = vmatprep.subr.mxu1 %v865_v33 }
 0x1bd   : > { %779 = vmatpush3.msra.mxu0 %v436_v47  ;;  %812 = vmatpush3.msra.mxu1 %v531_v57 }
 0x1be   : > { %780 = vmatprep.subr.mxu0 %v865_v33  ;;  %813 = vmatprep.subr.mxu1 %v865_v33 }
 0x1bf   : > { %781 = vmatpush3.msra.mxu0 %v435_v49  ;;  %814 = vmatpush3.msra.mxu1 %v530_v58 }
 0x1c0   : > { %782 = vmatprep.subr.mxu0 %v865_v33  ;;  %815 = vmatprep.subr.mxu1 %v865_v33 }
 0x1c1   : > { %783 = vmatpush3.msra.mxu0 %v434_v50  ;;  %816 = vmatpush3.msra.mxu1 %v529_v59 }
 0x1c2   : > { %784 = vmatprep.subr.mxu0 %v865_v33  ;;  %817 = vmatprep.subr.mxu1 %v865_v33 }
 0x1c3   : > { %785 = vmatpush3.msra.mxu0 %v433_v51  ;;  %818 = vmatpush3.msra.mxu1 %v528_v60 }
 0x1c4   : > { %786 = vmatprep.subr.mxu0 %v865_v33  ;;  %819 = vmatprep.subr.mxu1 %v865_v33 }
 0x1c5   : > { %787 = vmatpush3.msra.mxu0 %v432_v52  ;;  %820 = vmatpush3.msra.mxu1 %v527_v61 }
 0x1c6   : > { %788 = vmatprep.subr.mxu0 %v865_v33  ;;  %821 = vmatprep.subr.mxu1 %v865_v33 }
 0x1c7   : > { %789 = vmatpush3.msra.mxu0 %v431_v53  ;;  %822 = vmatpush3.msra.mxu1 %v526_v62 }
 0x1c8   : > { %790 = vmatprep.subr.mxu0 %v865_v33  ;;  %823 = vmatprep.subr.mxu1 %v865_v33 }
 0x1c9   : > { %791 = vmatpush3.msra.mxu0 %v430_v54  ;;  %824 = vmatpush3.msra.mxu1 %v525_v63 }
 0x1ca   : > { %792 = vmatprep.subr.mxu0 %v865_v33  ;;  %825 = vmatprep.subr.mxu1 %v865_v33 }
 0x1cb   : > { %793 = vmatpush3.msra.mxu0 %v429_v55  ;;  %826 = vmatpush3.msra.mxu1 %v524_v0 }
 0x1cc   : > { %795 = vmatmul.mubr.f32.vlgmr.msra.gmra.mxu0 %v428_v56  ;;  %827 = vmatprep.subr.mxu1 %v865_v33 }
 0x1cd   : > { %828 = vmatpush3.msra.mxu1 %v523_v1 }
 0x28c   : > { %v518_v3 = vpop.f32.mrf.mxu0 }
 0x28d   : > { %v519_v4 = vadd.f32 %v672_v2, %v518_v3 }
 0x28e   : > { %v796_v5 = vpop.f32.mrf.mxu0 }
 0x28f   : > { %850 = vtanh.f32 %v519_v4 }
 0x29c   : > { %v851_v6 = vpop.eup %850 }
 0x29d   : > { %830 = vmatmul.mubr.f32.vlgmr.msra.gmra.mxu1 %v851_v6 }
 0x35d   : > { %v612_v8 = vpop.f32.mrf.mxu1 }
 0x35e   : > { %v613_v9 = vadd.f32 %v673_v7, %v612_v8 }
 0x35f   : > { %v831_v10 = vpop.f32.mrf.mxu1 }
 0x360   : > { %v616_v11 = vmul.f32 %v613_v9, %v613_v9 }
 0x362   : > { %617 = vadd.xlane.f32.xlu0 %v616_v11 }
 0x3eb   : > { %v618_v12 = vpop.xlane.xlu0 %617 }
 0x3ec   : > { %v619_v13 = vmax.f32 %v618_v12, 1e-24 }
 0x3ee   : > { %852 = vrsqrt.f32 %v619_v13 }
 0x3fb   : > { %v853_v14 = vpop.eup %852 }
 0x3fc   : > { %v621_v15 = vmul.f32 %v853_v14, %v613_v9 }
 0x3fe   : > { %622 = vst [vmem:[%s932_s15] sm:$0xff] %v621_v15 }
 0x3ff PF: > { %s19_s30 = sadd.s32 1, %s860_s30  }
 0x400   : > { %p16_p6 = scmp.ge.s32.totalorder %s19_s30, 4  }
 0x402   :  { %18 = sbr.rel (!%p16_p6) target bundleno = 1 (0x1), region = 91 }

</bundles_post_ra>
